<compile_context>
chip_gen: v7x
topology: tpu7x:2x2x1
jax: 0.10.0
libtpu: 0.0.40
codegen_flags: <defaults>
</compile_context>

<pallas_src>
import functools

import jax
import jax.numpy as jnp
from jax.experimental import pallas as pl
from jax.experimental.pallas import tpu as pltpu


# ----------------------------- fused Pallas kernel -----------------------------

def _fused_fpo_kernel(x_ref, w1_ref, b1_ref, w2_ref, b2_ref,
                      w3a_ref, w3b_ref, b3_ref,
                      o_ref, acc1_ref, acc2_ref, *, inv_hw):
    """One row-tile of the fused FPO eval pipeline.

    grid = (N images ["parallel"], HW row-tiles ["arbitrary"]).
      stage 1: folded (pixel-norm + 1x1 conv + BN + ReLU); K=3 -> VPU FMAs.
      stage 2: 1x1 conv (bf16 MXU operands, f32 accumulation) + BN + ReLU.
      concat + AdaptiveAvgPool2d(1): per-image channel-sum accumulators in VMEM.
      last tile of each image: finalize the mean and apply the b3_head
      bottleneck (1x1 conv + BN), writing the (1, emb) neck feature.
    """
    j = pl.program_id(1)

    @pl.when(j == 0)
    def _init():
        acc1_ref[...] = jnp.zeros_like(acc1_ref)
        acc2_ref[...] = jnp.zeros_like(acc2_ref)

    x = x_ref[0]                                         # (thw, Cin) raw pixels, f32

    # --- stage 1: normalize + backbone stand-in conv + BN + ReLU, all folded.
    # K = Cin (3) is far too narrow for the MXU -> 3 broadcast FMAs on the VPU.
    y1 = b1_ref[...]                                     # (1, C1), broadcasts up
    for c in range(x.shape[1]):                          # static, unrolls (Cin=3)
        y1 = y1 + x[:, c:c + 1] * w1_ref[c:c + 1, :]
    y1 = jnp.maximum(y1, 0.0)                            # (thw, C1) f32

    # --- stage 2: res_conv5 stand-in; bf16 MXU matmul, f32 accumulation,
    #     BN scale pre-folded into the weight columns.
    y2 = jnp.dot(y1.astype(jnp.bfloat16), w2_ref[...],
                 preferred_element_type=jnp.float32)
    y2 = jnp.maximum(y2 + b2_ref[...], 0.0)              # (thw, C2) f32

    # --- channel concat + global-avg-pool: accumulate per-image channel sums.
    # The (M, C1+C2) "united" tensor never exists in HBM.
    acc1_ref[...] += jnp.sum(y1, axis=0, keepdims=True)
    acc2_ref[...] += jnp.sum(y2, axis=0, keepdims=True)

    # --- finalize on the last HW tile of this image.
    @pl.when(j == pl.num_programs(1) - 1)
    def _finalize():
        p1 = acc1_ref[...] * inv_hw                      # (1, C1) pooled mean
        p2 = acc2_ref[...] * inv_hw                      # (1, C2)
        # b3_head bottleneck: pooled @ W3 + b3 with W3 split by rows so the
        # channel concat is never materialized.
        neck = (jnp.dot(p1, w3a_ref[...], preferred_element_type=jnp.float32)
                + jnp.dot(p2, w3b_ref[...], preferred_element_type=jnp.float32)
                + b3_ref[...])                           # (1, emb)
        o_ref[0] = neck.astype(o_ref.dtype)


def _pick_row_tile(hw, target=512):
    """Largest divisor of hw that is a multiple of 8 and <= target (else hw).

    ~512 rows x (64+128) f32 intermediates is <1 MiB including double buffers,
    comfortably inside the scoped-VMEM budget on v5e/v6e (128 MiB) and v7x (64 MiB).
    """
    t = min(target, hw) // 8 * 8
    while t >= 8:
        if hw % t == 0:
            return t
        t -= 8
    return hw


def fused_fpo_pipeline(x_flat, w1, b1, w2, b2, w3a, w3b, b3, *, row_tile):
    """x_flat: (N, H*W, Cin) channels-last raw images. Returns (N, emb) f32."""
    N, HW, Cin = x_flat.shape
    C1 = w1.shape[1]
    C2 = w2.shape[1]
    emb = w3a.shape[1]
    assert HW % row_tile == 0 and (row_tile % 8 == 0 or row_tile == HW)
    n_hw = HW // row_tile

    kernel = functools.partial(_fused_fpo_kernel, inv_hw=1.0 / HW)
    const = lambda i, j: (0, 0)          # weights stay resident across the grid

    out = pl.pallas_call(
        kernel,
        out_shape=jax.ShapeDtypeStruct((N, 1, emb), jnp.float32),
        grid_spec=pltpu.PrefetchScalarGridSpec(
            num_scalar_prefetch=0,
            grid=(N, n_hw),
            in_specs=[
                pl.BlockSpec((1, row_tile, Cin), lambda i, j: (i, j, 0)),
                pl.BlockSpec((Cin, C1), const),   # folded stage-1 weight (f32)
                pl.BlockSpec((1, C1), const),     # folded stage-1 shift
                pl.BlockSpec((C1, C2), const),    # stage-2 weight (bf16)
                pl.BlockSpec((1, C2), const),     # stage-2 shift
                pl.BlockSpec((C1, emb), const),   # bottleneck weight rows [:C1]
                pl.BlockSpec((C2, emb), const),   # bottleneck weight rows [C1:]
                pl.BlockSpec((1, emb), const),    # bottleneck shift
            ],
            out_specs=pl.BlockSpec((1, 1, emb), lambda i, j: (i, 0, 0)),
            scratch_shapes=[pltpu.VMEM((1, C1), jnp.float32),
                            pltpu.VMEM((1, C2), jnp.float32)],
        ),
        compiler_params=pltpu.CompilerParams(
            dimension_semantics=("parallel", "arbitrary"),
            vmem_limit_bytes=32 * 1024 * 1024),
    )(x_flat, w1, b1, w2, b2, w3a, w3b, b3)
    return out[:, 0, :]


# ------------------------------ parameter folding ------------------------------

def _bn_scale_shift(gamma, beta, running_mean, running_var, eps=1e-5):
    scale = gamma / jnp.sqrt(running_var + eps)
    shift = beta - running_mean * scale
    return scale, shift


def _fold_params(params):
    """Fold pixel-norm and BN affines into conv weights/shifts (eval mode)."""
    pm, ps = params["pixel_mean"], params["pixel_std"]

    # stage 1: ((x - pm)/ps) @ w1 * s1 + h1  ==  x @ w1_eff + b1_eff
    s1, h1 = _bn_scale_shift(params["bb_gamma"], params["bb_beta"],
                             params["bb_mean"], params["bb_var"])
    w1s = params["bb_w"] * s1[None, :]                   # (Cin, C1)
    w1 = w1s / ps[:, None]
    b1 = (h1 - (pm / ps) @ w1s).reshape(1, -1)

    # stage 2: y @ l4_w * s2 + h2  ==  y @ (l4_w * s2) + h2   (bf16 MXU operand)
    s2, h2 = _bn_scale_shift(params["l4_gamma"], params["l4_beta"],
                             params["l4_mean"], params["l4_var"])
    w2 = (params["l4_w"] * s2[None, :]).astype(jnp.bfloat16)
    b2 = h2.reshape(1, -1)

    # bottleneck: pooled @ emb_w * s3 + h3, split by concat boundary.
    s3, h3 = _bn_scale_shift(params["neck_gamma"], params["neck_beta"],
                             params["neck_mean"], params["neck_var"])
    w3 = params["emb_w"] * s3[None, :]
    C1 = params["bb_w"].shape[1]
    b3 = h3.reshape(1, -1)
    return w1, b1, w2, b2, w3[:C1], w3[C1:], b3


# --------------------------------- model glue ---------------------------------

def init_params(key, cin=3, c1=64, c2=128, emb=32, num_classes=16):
    """Deterministic parameter init (kaiming-normal convs, default BN stats)."""
    ks = jax.random.split(key, 4)

    def kaiming(k, shape):  # 1x1 conv weight stored (Cin, Cout); fan_in = shape[0]
        return jax.random.normal(k, shape, jnp.float32) * jnp.sqrt(2.0 / shape[0])

    c3 = c1 + c2
    ones = lambda n: jnp.ones((n,), jnp.float32)
    zeros = lambda n: jnp.zeros((n,), jnp.float32)
    return {
        # register_buffer pixel_mean / pixel_std (fast-reid defaults)
        "pixel_mean": jnp.array([123.675, 116.28, 103.53], jnp.float32),
        "pixel_std": jnp.array([58.395, 57.12, 57.375], jnp.float32),
        # backbone stand-in stage (-> "res4f", C1 channels)
        "bb_w": kaiming(ks[0], (cin, c1)),
        "bb_gamma": ones(c1), "bb_beta": zeros(c1),
        "bb_mean": zeros(c1), "bb_var": ones(c1),
        # res_conv5 (layer4, last_stride=1) stand-in stage (-> "res5c", C2 channels)
        "l4_w": kaiming(ks[1], (c1, c2)),
        "l4_gamma": ones(c2), "l4_beta": zeros(c2),
        "l4_mean": zeros(c2), "l4_var": ones(c2),
        # b3_head bottleneck: Conv2d(c3, emb, 1, bias=False) + BN (bias_freeze)
        "emb_w": kaiming(ks[2], (c3, emb)),
        "neck_gamma": ones(emb), "neck_beta": zeros(emb),
        "neck_mean": zeros(emb), "neck_var": ones(emb),
        # classifier Linear(emb, num_classes, bias=False): built in __init__ but
        # unused on the eval path (eval returns neck_feat only).
        "cls_w": jax.random.normal(ks[3], (emb, num_classes), jnp.float32) * 0.001,
    }


def fpo_forward(images_nchw, params, *, row_tile=None):
    """FPO.forward (eval branch): returns b3_head neck features (N, emb)."""
    N, C, H, W = images_nchw.shape
    # NCHW -> channels-last (channels on TPU lanes), flatten spatial per image.
    x = jnp.transpose(images_nchw, (0, 2, 3, 1)).reshape(N, H * W, C)

    if row_tile is None:
        row_tile = _pick_row_tile(H * W)

    # TODO(synk): the ResNet-50 backbone (conv1..layer3) and res_conv5 (layer4)
    # are external, config-built modules; each is substituted by ONE 1x1-conv +
    # BN + ReLU stage that preserves the channel / same-spatial concat contract
    # (last_stride=1), so the FPO-specific pipeline (preprocess -> backbone ->
    # res_conv5 -> concat -> b3_head pool + bottleneck) is reproduced exactly.
    folded = _fold_params(params)
    return fused_fpo_pipeline(x, *folded, row_tile=row_tile)


def fpo_forward_reference(images_nchw, params):
    """Unfused jnp reference of the same eval forward (correctness check only).

    Mirrors the kernel's bf16-weight policy on the heavy matmul so the
    comparison isolates fusion/folding errors rather than quantization noise.
    """
    N, C, H, W = images_nchw.shape
    x = jnp.transpose(images_nchw, (0, 2, 3, 1)).reshape(N * H * W, C)
    x = (x - params["pixel_mean"]) / params["pixel_std"]

    s1, h1 = _bn_scale_shift(params["bb_gamma"], params["bb_beta"],
                             params["bb_mean"], params["bb_var"])
    r4 = jnp.maximum(x @ params["bb_w"] * s1 + h1, 0.0)

    s2, h2 = _bn_scale_shift(params["l4_gamma"], params["l4_beta"],
                             params["l4_mean"], params["l4_var"])
    w2 = (params["l4_w"] * s2).astype(jnp.bfloat16).astype(jnp.float32)
    r5 = jnp.maximum(r4 @ w2 + h2, 0.0)

    united = jnp.concatenate([r4, r5], axis=-1).reshape(N, H * W, -1)
    pooled = jnp.mean(united, axis=1)

    s3, h3 = _bn_scale_shift(params["neck_gamma"], params["neck_beta"],
                             params["neck_mean"], params["neck_var"])
    return pooled @ params["emb_w"] * s3 + h3


if __name__ == "__main__":
    key = jax.random.PRNGKey(0)
    pkey, xkey = jax.random.split(key)

    params = init_params(pkey, cin=3, c1=64, c2=128, emb=32, num_classes=16)
    # small, deterministic "image" batch in [0, 255) — NCHW like PyTorch.
    images = jax.random.uniform(xkey, (2, 3, 16, 16), jnp.float32, 0.0, 255.0)

    fwd = jax.jit(fpo_forward, static_argnames=("row_tile",))
    # row_tile=128 -> 2 HW tiles per image: exercises the accumulate/finalize path.
    out = jax.block_until_ready(fwd(images, params, row_tile=128))

    assert out.shape == (2, 32) and out.dtype == jnp.float32
    assert bool(jnp.all(jnp.isfinite(out)))

    ref = jax.block_until_ready(fpo_forward_reference(images, params))
    assert bool(jnp.allclose(out, ref, rtol=5e-2, atol=5e-2)), (
        "fused kernel diverges from reference")

    print("KERNEL_OK")
</pallas_src>

<mosaic_0001>
module attributes {stable_mosaic.version = 11 : i64} {
  func.func @_fused_fpo_kernel(%arg0: i32, %arg1: i32, %arg2: memref<1x128x3xf32, #tpu.memory_space<vmem>>, %arg3: memref<3x64xf32, #tpu.memory_space<vmem>>, %arg4: memref<1x64xf32, #tpu.memory_space<vmem>>, %arg5: memref<64x128xbf16, #tpu.memory_space<vmem>>, %arg6: memref<1x128xf32, #tpu.memory_space<vmem>>, %arg7: memref<64x32xf32, #tpu.memory_space<vmem>>, %arg8: memref<128x32xf32, #tpu.memory_space<vmem>>, %arg9: memref<1x32xf32, #tpu.memory_space<vmem>>, %arg10: memref<1x1x32xf32, #tpu.memory_space<vmem>>, %arg11: memref<1x64xf32, #tpu.memory_space<vmem>>, %arg12: memref<1x128xf32, #tpu.memory_space<vmem>>) attributes {dimension_semantics = [#tpu.dimension_semantics<parallel>, #tpu.dimension_semantics<arbitrary>], iteration_bounds = array<i64: 2, 2>, scalar_prefetch = 0 : i64, scratch_operands = 2 : i64, tpu.core_type = #tpu.core_type<tc>, window_params = [{transform_indices = @transform_0, window_bounds = array<i64: 1, 128, 3>}, {pipeline_mode = #tpu.pipeline_mode<synchronous>, transform_indices = @transform_1, window_bounds = array<i64: 3, 64>}, {pipeline_mode = #tpu.pipeline_mode<synchronous>, transform_indices = @transform_2, window_bounds = array<i64: 1, 64>}, {pipeline_mode = #tpu.pipeline_mode<synchronous>, transform_indices = @transform_3, window_bounds = array<i64: 64, 128>}, {pipeline_mode = #tpu.pipeline_mode<synchronous>, transform_indices = @transform_4, window_bounds = array<i64: 1, 128>}, {pipeline_mode = #tpu.pipeline_mode<synchronous>, transform_indices = @transform_5, window_bounds = array<i64: 64, 32>}, {pipeline_mode = #tpu.pipeline_mode<synchronous>, transform_indices = @transform_6, window_bounds = array<i64: 128, 32>}, {pipeline_mode = #tpu.pipeline_mode<synchronous>, transform_indices = @transform_7, window_bounds = array<i64: 1, 32>}, {transform_indices = @transform_8, window_bounds = array<i64: 1, 1, 32>}]} {
    %c0_i32 = arith.constant 0 : i32
    %0 = arith.cmpi eq, %arg1, %c0_i32 : i32
    %1 = arith.extui %0 : i1 to i32
    %c0_i32_0 = arith.constant 0 : i32
    %2 = arith.cmpi ne, %1, %c0_i32_0 : i32
    scf.if %2 {
      %cst_26 = arith.constant 0.000000e+00 : f32
      %48 = vector.broadcast %cst_26 : f32 to vector<1x64xf32>
      %c0_27 = arith.constant 0 : index
      %c0_28 = arith.constant 0 : index
      %49 = vector.load %arg11[%c0_27, %c0_28] : memref<1x64xf32, #tpu.memory_space<vmem>>, vector<1x64xf32>
      tpu.vector_store %arg11[%c0_27, %c0_28], %48 {strides = array<i32>} : memref<1x64xf32, #tpu.memory_space<vmem>>, vector<1x64xf32>,
      %cst_29 = arith.constant 0.000000e+00 : f32
      %50 = vector.broadcast %cst_29 : f32 to vector<1x128xf32>
      %c0_30 = arith.constant 0 : index
      %c0_31 = arith.constant 0 : index
      %51 = vector.load %arg12[%c0_30, %c0_31] : memref<1x128xf32, #tpu.memory_space<vmem>>, vector<1x128xf32>
      tpu.vector_store %arg12[%c0_30, %c0_31], %50 {strides = array<i32>} : memref<1x128xf32, #tpu.memory_space<vmem>>, vector<1x128xf32>,
    } else {
    }
    %c0 = arith.constant 0 : index
    %c0_1 = arith.constant 0 : index
    %c0_2 = arith.constant 0 : index
    %3 = vector.load %arg2[%c0, %c0_1, %c0_2] : memref<1x128x3xf32, #tpu.memory_space<vmem>>, vector<1x128x3xf32>
    %4 = vector.shape_cast %3 : vector<1x128x3xf32> to vector<128x3xf32>
    %c0_3 = arith.constant 0 : index
    %c0_4 = arith.constant 0 : index
    %5 = vector.load %arg4[%c0_3, %c0_4] : memref<1x64xf32, #tpu.memory_space<vmem>>, vector<1x64xf32>
    %6 = vector.extract_strided_slice %4 {offsets = [0, 0], sizes = [128, 1], strides = [1, 1]} : vector<128x3xf32> to vector<128x1xf32>
    %c0_5 = arith.constant 0 : index
    %c0_6 = arith.constant 0 : index
    %7 = vector.load %arg3[%c0_5, %c0_6] : memref<3x64xf32, #tpu.memory_space<vmem>>, vector<1x64xf32>
    %8 = vector.broadcast %6 : vector<128x1xf32> to vector<128x64xf32>
    %9 = vector.broadcast %7 : vector<1x64xf32> to vector<128x64xf32>
    %10 = arith.mulf %8, %9 : vector<128x64xf32>
    %11 = vector.broadcast %5 : vector<1x64xf32> to vector<128x64xf32>
    %12 = arith.addf %11, %10 : vector<128x64xf32>
    %13 = vector.extract_strided_slice %4 {offsets = [0, 1], sizes = [128, 1], strides = [1, 1]} : vector<128x3xf32> to vector<128x1xf32>
    %c1 = arith.constant 1 : index
    %c0_7 = arith.constant 0 : index
    %14 = vector.load %arg3[%c1, %c0_7] : memref<3x64xf32, #tpu.memory_space<vmem>>, vector<1x64xf32>
    %15 = vector.broadcast %13 : vector<128x1xf32> to vector<128x64xf32>
    %16 = vector.broadcast %14 : vector<1x64xf32> to vector<128x64xf32>
    %17 = arith.mulf %15, %16 : vector<128x64xf32>
    %18 = arith.addf %12, %17 : vector<128x64xf32>
    %19 = vector.extract_strided_slice %4 {offsets = [0, 2], sizes = [128, 1], strides = [1, 1]} : vector<128x3xf32> to vector<128x1xf32>
    %c2 = arith.constant 2 : index
    %c0_8 = arith.constant 0 : index
    %20 = vector.load %arg3[%c2, %c0_8] : memref<3x64xf32, #tpu.memory_space<vmem>>, vector<1x64xf32>
    %21 = vector.broadcast %19 : vector<128x1xf32> to vector<128x64xf32>
    %22 = vector.broadcast %20 : vector<1x64xf32> to vector<128x64xf32>
    %23 = arith.mulf %21, %22 : vector<128x64xf32>
    %24 = arith.addf %18, %23 : vector<128x64xf32>
    %cst = arith.constant 0.000000e+00 : f32
    %25 = vector.broadcast %cst : f32 to vector<128x64xf32>
    %26 = arith.maximumf %24, %25 : vector<128x64xf32>
    %27 = arith.truncf %26 : vector<128x64xf32> to vector<128x64xbf16>
    %c0_9 = arith.constant 0 : index
    %c0_10 = arith.constant 0 : index
    %28 = vector.load %arg5[%c0_9, %c0_10] : memref<64x128xbf16, #tpu.memory_space<vmem>>, vector<64x128xbf16>
    %cst_11 = arith.constant dense<0.000000e+00> : vector<128x128xf32>
    %29 = tpu.matmul %27, %28, %cst_11 {dimension_numbers = #tpu.dot_dimension_numbers<[1], [0], [0], [1], [0, 0, 1, 1], [], []>} : vector<128x64xbf16>, vector<64x128xbf16>, vector<128x128xf32> -> vector<128x128xf32>
    %c0_12 = arith.constant 0 : index
    %c0_13 = arith.constant 0 : index
    %30 = vector.load %arg6[%c0_12, %c0_13] : memref<1x128xf32, #tpu.memory_space<vmem>>, vector<1x128xf32>
    %31 = vector.broadcast %30 : vector<1x128xf32> to vector<128x128xf32>
    %32 = arith.addf %29, %31 : vector<128x128xf32>
    %cst_14 = arith.constant 0.000000e+00 : f32
    %33 = vector.broadcast %cst_14 : f32 to vector<128x128xf32>
    %34 = arith.maximumf %32, %33 : vector<128x128xf32>
    %c0_15 = arith.constant 0 : index
    %c0_16 = arith.constant 0 : index
    %35 = vector.load %arg11[%c0_15, %c0_16] : memref<1x64xf32, #tpu.memory_space<vmem>>, vector<1x64xf32>
    %cst_17 = arith.constant dense<0.000000e+00> : vector<64xf32>
    %36 = vector.multi_reduction <add>, %26, %cst_17 [0] : vector<128x64xf32> to vector<64xf32>
    %37 = vector.shape_cast %36 : vector<64xf32> to vector<1x64xf32>
    %38 = arith.addf %35, %37 : vector<1x64xf32>
    %c0_18 = arith.constant 0 : index
    %c0_19 = arith.constant 0 : index
    %39 = vector.load %arg11[%c0_18, %c0_19] : memref<1x64xf32, #tpu.memory_space<vmem>>, vector<1x64xf32>
    tpu.vector_store %arg11[%c0_18, %c0_19], %38 {strides = array<i32>} : memref<1x64xf32, #tpu.memory_space<vmem>>, vector<1x64xf32>,
    %c0_20 = arith.constant 0 : index
    %c0_21 = arith.constant 0 : index
    %40 = vector.load %arg12[%c0_20, %c0_21] : memref<1x128xf32, #tpu.memory_space<vmem>>, vector<1x128xf32>
    %cst_22 = arith.constant dense<0.000000e+00> : vector<128xf32>
    %41 = vector.multi_reduction <add>, %34, %cst_22 [0] : vector<128x128xf32> to vector<128xf32>
    %42 = vector.shape_cast %41 : vector<128xf32> to vector<1x128xf32>
    %43 = arith.addf %40, %42 : vector<1x128xf32>
    %c0_23 = arith.constant 0 : index
    %c0_24 = arith.constant 0 : index
    %44 = vector.load %arg12[%c0_23, %c0_24] : memref<1x128xf32, #tpu.memory_space<vmem>>, vector<1x128xf32>
    tpu.vector_store %arg12[%c0_23, %c0_24], %43 {strides = array<i32>} : memref<1x128xf32, #tpu.memory_space<vmem>>, vector<1x128xf32>,
    %c1_i32 = arith.constant 1 : i32
    %45 = arith.cmpi eq, %arg1, %c1_i32 : i32
    %46 = arith.extui %45 : i1 to i32
    %c0_i32_25 = arith.constant 0 : i32
    %47 = arith.cmpi ne, %46, %c0_i32_25 : i32
    scf.if %47 {
      %c0_26 = arith.constant 0 : index
      %c0_27 = arith.constant 0 : index
      %48 = vector.load %arg11[%c0_26, %c0_27] : memref<1x64xf32, #tpu.memory_space<vmem>>, vector<1x64xf32>
      %cst_28 = arith.constant 3.906250e-03 : f32
      %49 = vector.broadcast %cst_28 : f32 to vector<1x64xf32>
      %50 = arith.mulf %48, %49 : vector<1x64xf32>
      %c0_29 = arith.constant 0 : index
      %c0_30 = arith.constant 0 : index
      %51 = vector.load %arg12[%c0_29, %c0_30] : memref<1x128xf32, #tpu.memory_space<vmem>>, vector<1x128xf32>
      %cst_31 = arith.constant 3.906250e-03 : f32
      %52 = vector.broadcast %cst_31 : f32 to vector<1x128xf32>
      %53 = arith.mulf %51, %52 : vector<1x128xf32>
      %c0_32 = arith.constant 0 : index
      %c0_33 = arith.constant 0 : index
      %54 = vector.load %arg7[%c0_32, %c0_33] : memref<64x32xf32, #tpu.memory_space<vmem>>, vector<64x32xf32>
      %cst_34 = arith.constant dense<0.000000e+00> : vector<1x32xf32>
      %55 = tpu.matmul %50, %54, %cst_34 {dimension_numbers = #tpu.dot_dimension_numbers<[1], [0], [0], [1], [0, 0, 1, 1], [], []>} : vector<1x64xf32>, vector<64x32xf32>, vector<1x32xf32> -> vector<1x32xf32>
      %c0_35 = arith.constant 0 : index
      %c0_36 = arith.constant 0 : index
      %56 = vector.load %arg8[%c0_35, %c0_36] : memref<128x32xf32, #tpu.memory_space<vmem>>, vector<128x32xf32>
      %cst_37 = arith.constant dense<0.000000e+00> : vector<1x32xf32>
      %57 = tpu.matmul %53, %56, %cst_37 {dimension_numbers = #tpu.dot_dimension_numbers<[1], [0], [0], [1], [0, 0, 1, 1], [], []>} : vector<1x128xf32>, vector<128x32xf32>, vector<1x32xf32> -> vector<1x32xf32>
      %58 = arith.addf %55, %57 : vector<1x32xf32>
      %c0_38 = arith.constant 0 : index
      %c0_39 = arith.constant 0 : index
      %59 = vector.load %arg9[%c0_38, %c0_39] : memref<1x32xf32, #tpu.memory_space<vmem>>, vector<1x32xf32>
      %60 = arith.addf %58, %59 : vector<1x32xf32>
      %c0_40 = arith.constant 0 : index
      %c0_41 = arith.constant 0 : index
      %c0_42 = arith.constant 0 : index
      %61 = vector.load %arg10[%c0_40, %c0_41, %c0_42] : memref<1x1x32xf32, #tpu.memory_space<vmem>>, vector<1x1x32xf32>
      %62 = vector.shape_cast %61 : vector<1x1x32xf32> to vector<1x32xf32>
      %63 = vector.shape_cast %60 : vector<1x32xf32> to vector<1x1x32xf32>
      tpu.vector_store %arg10[%c0_40, %c0_41, %c0_42], %63 {strides = array<i32>} : memref<1x1x32xf32, #tpu.memory_space<vmem>>, vector<1x1x32xf32>,
    } else {
    }
    return
  }
  func.func @transform_0(%arg0: i32, %arg1: i32) -> (i32, i32, i32) {
    %c0_i32 = arith.constant 0 : i32
    %c0_i32_0 = arith.constant 0 : i32
    return %arg0, %arg1, %c0_i32 : i32, i32, i32
  }
  func.func @transform_1(%arg0: i32, %arg1: i32) -> (i32, i32) {
    %c0_i32 = arith.constant 0 : i32
    %c0_i32_0 = arith.constant 0 : i32
    %c0_i32_1 = arith.constant 0 : i32
    return %c0_i32, %c0_i32_0 : i32, i32
  }
  func.func @transform_2(%arg0: i32, %arg1: i32) -> (i32, i32) {
    %c0_i32 = arith.constant 0 : i32
    %c0_i32_0 = arith.constant 0 : i32
    %c0_i32_1 = arith.constant 0 : i32
    return %c0_i32, %c0_i32_0 : i32, i32
  }
  func.func @transform_3(%arg0: i32, %arg1: i32) -> (i32, i32) {
    %c0_i32 = arith.constant 0 : i32
    %c0_i32_0 = arith.constant 0 : i32
    %c0_i32_1 = arith.constant 0 : i32
    return %c0_i32, %c0_i32_0 : i32, i32
  }
  func.func @transform_4(%arg0: i32, %arg1: i32) -> (i32, i32) {
    %c0_i32 = arith.constant 0 : i32
    %c0_i32_0 = arith.constant 0 : i32
    %c0_i32_1 = arith.constant 0 : i32
    return %c0_i32, %c0_i32_0 : i32, i32
  }
  func.func @transform_5(%arg0: i32, %arg1: i32) -> (i32, i32) {
    %c0_i32 = arith.constant 0 : i32
    %c0_i32_0 = arith.constant 0 : i32
    %c0_i32_1 = arith.constant 0 : i32
    return %c0_i32, %c0_i32_0 : i32, i32
  }
  func.func @transform_6(%arg0: i32, %arg1: i32) -> (i32, i32) {
    %c0_i32 = arith.constant 0 : i32
    %c0_i32_0 = arith.constant 0 : i32
    %c0_i32_1 = arith.constant 0 : i32
    return %c0_i32, %c0_i32_0 : i32, i32
  }
  func.func @transform_7(%arg0: i32, %arg1: i32) -> (i32, i32) {
    %c0_i32 = arith.constant 0 : i32
    %c0_i32_0 = arith.constant 0 : i32
    %c0_i32_1 = arith.constant 0 : i32
    return %c0_i32, %c0_i32_0 : i32, i32
  }
  func.func @transform_8(%arg0: i32, %arg1: i32) -> (i32, i32, i32) {
    %c0_i32 = arith.constant 0 : i32
    %c0_i32_0 = arith.constant 0 : i32
    %c0_i32_1 = arith.constant 0 : i32
    return %arg0, %c0_i32, %c0_i32_0 : i32, i32, i32
  }
}

</mosaic_0001>

<bundles_post_ra>
// kernel: div.13
= control target key start
LH: loop header
LB: loop body
LE: loop exit
PB: predicated region body
PF: predicated region fallthrough
CT: control target
= control target key end

     0   :  { %s37_s0 = inlined_call_operand.vmem [shape: f32[3], index: 0, kind: input, shape index: {}]   ;;  %s38_s1 = inlined_call_operand.vmem [shape: f32[3], index: 1, kind: input, shape index: {}]   ;;  %s39_s2 = inlined_call_operand.vmem [shape: f32[3], index: 2, kind: output, shape index: {}]  }
   0x1   :  { %v4_v0 = vld [vmem:[%s38_s1] sm:$0x1] }
   0x2   :  { %11 = vrcp.f32 %v4_v0  ;;  %v3_v1 = vld [vmem:[%s37_s0] sm:$0x1] }
   0xc   :  { %v12_v2 = vpop.eup %11 }
   0xd   :  { %v8_v3 = vmul.f32 %v12_v2, %v3_v1 }
   0xf   :  { %10 = vst [vmem:[%s39_s2] sm:$0x1] %v8_v3 }

// kernel: fpo_forward.1
= control target key start
LH: loop header
LB: loop body
LE: loop exit
PB: predicated region body
PF: predicated region fallthrough
CT: control target
= control target key end

     0   :  { %s2054_s0 = inlined_call_operand.vmem [shape: f32[2,256,3], index: 0, kind: input, shape index: {}]   ;;  %s2055_s1 = inlined_call_operand.vmem [shape: f32[3,64], index: 1, kind: input, shape index: {}]   ;;  %s2056_s2 = inlined_call_operand.vmem [shape: f32[1,64], index: 2, kind: input, shape index: {}]   ;;  %s2057_s3 = inlined_call_operand.vmem [shape: bf16[64,128], index: 3, kind: input, shape index: {}]   ;;  %s2058_s4 = inlined_call_operand.vmem [shape: f32[1,128], index: 4, kind: input, shape index: {}]   ;;  %s2059_s5 = inlined_call_operand.vmem [shape: f32[64,32], index: 5, kind: input, shape index: {}]   ;;  %s2060_s6 = inlined_call_operand.vmem [shape: f32[128,32], index: 6, kind: input, shape index: {}]   ;;  %s2061_s7 = inlined_call_operand.vmem [shape: f32[1,32], index: 7, kind: input, shape index: {}]   ;;  %s2062_s8 = inlined_call_operand.hbm [shape: f32[2,1,32], index: 8, kind: output, shape index: {}]  }
   0x1   :  { %2065 = sst [smem:[#allocation8_spill]] %s2054_s0 }
   0x2   :  { %13 = vsyncpa [#allocation5], 0 }
   0x3   :  { %15 = vsyncpa [#allocation5 + $0x1], 0  ;;  %s1649_s27 = smov 0   ;;  %s1651_s28 = smov 0  }
   0x4   :  { %s1653_s29 = smov 0   ;;  %s1655_s30 = smov 0  }
   0x5   :  { %s1657_s9 = smov 0   ;;  %s1659_s10 = smov 0  }
   0x6   :  { %s1661_s11 = smov 0   ;;  %s1663_s12 = smov 0  }
   0x7 LB: > { %s1211_s13 = sadd.s32 4294967295, %s1594_s12   ;;  %s1212_s14 = sadd.s32 4294967294, %s1594_s12   ;;  %s1594_s12 = sphi %s1663_s12, %s21_s12   ;;  %s1590_s11 = sphi %s1661_s11, %s2078_s11   ;;  %s1586_s10 = sphi %s1659_s10, %s2077_s10   ;;  %s1582_s9 = sphi %s1657_s9, %s2076_s9   ;;  %s1578_s30 = sphi %s1655_s30, %s2075_s30   ;;  %s1574_s29 = sphi %s1653_s29, %s2074_s29   ;;  %s1570_s28 = sphi %s1651_s28, %s2073_s28   ;;  %s1566_s27 = sphi %s1649_s27, %s2072_s27  }
   0x8   : > { %s30_s15 = sadd.s32 1, %s1586_s10  ;;  %s33_s16 = sadd.s32 1, %s1590_s11 }
   0x9   : > { %p31_p0 = scmp.ge.s32.totalorder %s30_s15, 2  ;;  %p225_p1 = scmp.ne.s32.totalorder %s1574_s29, %s1570_s28 }
   0xa   : > { %p226_p2 = scmp.eq.s32.totalorder %s1211_s13, 3  ;;  %p231_p4 = scmp.ne.s32.totalorder %s1570_s28, %s1566_s27 }
   0xb   : > { %s2080_s15 = smov (%p31_p0, %s30_s15), 0  ;;  %s2082_s16 = smov (!%p31_p0, %s33_s16), %s1590_s11 }
   0xc   : > { %p1698_p3 = por %p226_p2, %p225_p1  ;;  %p35_p5 = scmp.ge.s32.totalorder %s2082_s16, 2 }
   0xd   : > { %p232_p6 = scmp.eq.s32.totalorder %s1212_s14, 3  ;;  %p1215_p7 = scmp.ge.s32.totalorder %s1594_s12, 1 }
   0xe   : > { %p284_p8 = scmp.lt.s32.totalorder %s1594_s12, 5  ;;  %s2084_s16 = smov (%p35_p5, %s2082_s16), 0 }
   0xf   : > { %2067 = sst [smem:[#allocation7_spill]] %s2084_s16  ;;  %p1708_p9 = por %p232_p6, %p231_p4 }
  0x10   : > { %p285_p10 = pnand %p1215_p7, %p284_p8  ;;  %s212_s19 = ssub.s32 %s1590_s11, %s2084_s16 }
  0x11   : > { %s215_s20 = sadd.s32 1, %s1574_s29  ;;  %p213_p11 = scmp.eq.s32.totalorder %s212_s19, 0 }
  0x12   : > { %288 = sbr.rel (%p285_p10) target bundleno = 785 (0x311), region = 52  ;;  %s2064_s22 = sand.u32 (!%p285_p10), 1, %s1570_s28  }
  0x13   : > { %s1716_s21 = scalar_select %p213_p11, %s1574_s29, %s215_s20  }
  0x14   : > { %s1216_s23 = sshll.u32 (!%p285_p10), %s1578_s30, 4  ;;  %p322_p12 = scmp.lt.s32.totalorder (!%p285_p10), %s1582_s9, 1 }
  0x15   : > { %p324_p13 = scmp.lt.s32.totalorder (!%p285_p10), %s1216_s23, 31  ;;  %s2069_s0 = sld [smem:[#allocation8_spill]] (!%p285_p10) }
  0x16   : > { %s1729_s20 = scalar_lea.vmem (!%p285_p10), [#allocation4], %s2064_s22  ;;  %p1219_p0 = scmp.ne.s32.totalorder (!%p285_p10), %s1578_s30, 0 }
  0x19   : > { %s323_s24 = scalar_select %p322_p12, %s1582_s9, 1 }
  0x1a   : > { %s2086_s23 = smov (!%p324_p13, %s1216_s23), 31  ;;  %335 = sbr.rel (%p1219_p0) target bundleno = 33 (0x21), region = 56 }
  0x1b   : > { %s1217_s25 = sshll.u32 %s323_s24, 5  ;;  %vm336_vm0 = vcmask (!%p1219_p0), 516096   ;;  %v1596_v0 = vmov (!%p1219_p0), 0.0  }
  0x1c   : > { %s327_s26 = sadd.s32 %s1217_s25, %s2086_s23  ;;  %337 = vst.msk [vmem:[#allocation2] sm:$0x1] (!%p1219_p0), %vm336_vm0, %v1596_v0  ;;  %338 = vst [vmem:[#allocation3] sm:$0x1] (!%p1219_p0), %v1596_v0 }
  0x1d   : > { %s1218_s13 = sshll.u32 %s327_s26, 3 }
  0x1e   : > { %s1725_s19 = scalar_lea.vmem %s2069_s0, %s1218_s13 }
  0x21 PF: > { %v341_v1 = vld [vmem:[%s1725_s19 + $0x10] sm:$0xff]  ;;  %v340_v2 = vld [vmem:[%s1725_s19 + $0x8] sm:$0xff]  ;;  %v1597_v3 = vmov 2   ;;  %v1598_v4 = vmov 0   ;;  %v342_v5 = vld [vmem:[%s1725_s19 + $0x18] sm:$0xff]  ;;  %v1599_v8 = vmov 1  }
  0x22   : > { %1483 = vset.pattern.permute.xlu0 %v1597_v3  ;;  %1480 = vset.pattern.permute.xlu1 %v1598_v4  ;;  %v343_v6 = vld [vmem:[%s1725_s19 + $0x20] sm:$0xff]  ;;  %v346_v7 = vld [vmem:[%s1725_s19 + $0x38] sm:$0xff]  ;;  %v1741_v9 = vld [vmem:[%s1725_s19 + $0x48] sm:$0xff]  ;;  %vm744_vm1 = vcmask 523264   ;;  %vm921_vm2 = vcmask 516096   ;;  %p1237_p1 = scmp.ne.s32.totalorder %s1578_s30, 1 }
  0x23   : > { %369 = vperm.xlu1 %1480, %v341_v1   ;;  %586 = vperm.xlu0 %1483, %v340_v2   ;;  %v339_v10 = vld [vmem:[%s1725_s19] sm:$0xff]  ;;  %v344_v11 = vld [vmem:[%s1725_s19 + $0x28] sm:$0xff]  ;;  %v345_v12 = vld [vmem:[%s1725_s19 + $0x30] sm:$0xff]  ;;  %vm1601_vm3 = vmmov (!%p1237_p1), 0   ;;  %vm1124_vm4 = vcmask (!%p1237_p1), 253952  }
  0x24   : > { %v351_v13 = vld [vmem:[%s1725_s19 + $0x60] sm:$0xff]  ;;  %v354_v14 = vld [vmem:[%s1725_s19 + $0x78] sm:$0xff]  ;;  %v1497_v16 = vld [vmem:[%s2057_s3 + $0x8] sm:$0xff]  }
  0x25   : > { %v1496_v15 = vld [vmem:[%s2057_s3] sm:$0xff]   ;;  %v1498_v17 = vld [vmem:[%s2057_s3 + $0x10] sm:$0xff]   ;;  %v1499_v18 = vld [vmem:[%s2057_s3 + $0x18] sm:$0xff]  }
  0x26   : > { %1280 = vmatprep.subr.bf16.mxu0 %v1496_v15  ;;  %1394 = vmatprep.subr.bf16.mxu1 %v1496_v15  ;;  %v347_v19 = vld [vmem:[%s1725_s19 + $0x40] sm:$0xff]  ;;  %v350_v20 = vld [vmem:[%s1725_s19 + $0x58] sm:$0xff]  ;;  %v349_v21 = vld [vmem:[%s1725_s19 + $0x50] sm:$0xff] }
  0x27   : > { %374 = vperm.xlu1 %1480, %v342_v5   ;;  %598 = vperm.xlu0 %1483, %v343_v6   ;;  %v352_v22 = vld [vmem:[%s1725_s19 + $0x68] sm:$0xff]  ;;  %v353_v23 = vld [vmem:[%s1725_s19 + $0x70] sm:$0xff]  ;;  %v1790_v41 = vld [vmem:[%s2055_s1] ss:$0 sm:$0xff] }
  0x28   : > { %1281 = vmatpush3.bf16.msra.mxu0 %v1496_v15  ;;  %1398 = vmatpush3.bf16.msra.mxu1 %v1496_v15  ;;  %v1798_v45 = vld [vmem:[%s2056_s2] ss:$0 sm:$0xff]  ;;  %v1803_v46 = vld [vmem:[%s2055_s1 + $0x1] ss:$0 sm:$0xff]  ;;  %v1814_v53 = vld [vmem:[%s2055_s1 + $0x2] ss:$0 sm:$0xff] }
  0x29   : > { %1282 = vmatprep.subr.bf16.mxu0 %v1497_v16  ;;  %1395 = vmatprep.subr.bf16.mxu1 %v1497_v16 }
  0x2b   : > { %1481 = vset.pattern.permute.xlu1 %v1599_v8  ;;  %610 = vperm.xlu0 %1483, %v346_v7  }
  0x2c   : > { %485 = vperm.xlu1 %1481, %v340_v2   ;;  %1283 = vmatpush3.bf16.msra.mxu0 %v1497_v16 }
  0x2d   : > { %1399 = vmatpush3.bf16.msra.mxu1 %v1497_v16  ;;  %1284 = vmatprep.subr.bf16.mxu0 %v1498_v17 }
  0x2e   : > { %1396 = vmatprep.subr.bf16.mxu1 %v1498_v17 }
  0x2f   : > { %618 = vperm.xlu0 %1483, %v1741_v9  }
  0x30   : > { %489 = vperm.xlu1 %1481, %v341_v1   ;;  %1285 = vmatpush3.bf16.msra.mxu0 %v1498_v17 }
  0x31   : > { %1400 = vmatpush3.bf16.msra.mxu1 %v1498_v17  ;;  %1286 = vmatprep.subr.bf16.mxu0 %v1499_v18 }
  0x32   : > { %1397 = vmatprep.subr.bf16.mxu1 %v1499_v18 }
  0x33   : > { %1490 = vset.pattern.permute.xlu0 %v1598_v4 }
  0x34   : > { %1482 = vset.pattern.permute.xlu1 %v1597_v3  ;;  %359 = vperm.xlu0 %1490, %v339_v10  }
  0x35   : > { %582 = vperm.xlu1 %1482, %v339_v10   ;;  %1287 = vmatpush3.bf16.msra.mxu0 %v1499_v18 }
  0x36   : > { %1401 = vmatpush3.bf16.msra.mxu1 %v1499_v18 }
  0x38   : > { %364 = vperm.xlu0 %1490, %v340_v2  }
  0x39   : > { %590 = vperm.xlu1 %1482, %v341_v1  }
  0x3c   : > { %379 = vperm.xlu0 %1490, %v343_v6  }
  0x3d   : > { %594 = vperm.xlu1 %1482, %v342_v5  }
  0x40   : > { %394 = vperm.xlu0 %1490, %v346_v7  }
  0x41   : > { %1484 = vset.pattern.permute.xlu1 %v1598_v4 }
  0x42   : > { %384 = vperm.xlu1 %1484, %v344_v11  }
  0x44   : > { %404 = vperm.xlu0 %1490, %v1741_v9  }
  0x46   : > { %389 = vperm.xlu1 %1484, %v345_v12  }
  0x48   : > { %419 = vperm.xlu0 %1490, %v351_v13  }
  0x4a   : > { %1485 = vset.pattern.permute.xlu1 %v1599_v8 }
  0x4b   : > { %497 = vperm.xlu1 %1485, %v343_v6  }
  0x4c   : > { %434 = vperm.xlu0 %1490, %v354_v14  }
  0x4f   : > { %505 = vperm.xlu1 %1485, %v345_v12  }
  0x50   : > { %1492 = vset.pattern.permute.xlu0 %v1599_v8 }
  0x51   : > { %481 = vperm.xlu0 %1492, %v339_v10  }
  0x53   : > { %509 = vperm.xlu1 %1485, %v346_v7  }
  0x55   : > { %493 = vperm.xlu0 %1492, %v342_v5  }
  0x57   : > { %1486 = vset.pattern.permute.xlu1 %v1597_v3 }
  0x58   : > { %602 = vperm.xlu1 %1486, %v344_v11  }
  0x59   : > { %501 = vperm.xlu0 %1492, %v344_v11  }
  0x5c   : > { %606 = vperm.xlu1 %1486, %v345_v12  }
  0x5d   : > { %513 = vperm.xlu0 %1492, %v347_v19  }
  0x60   : > { %1487 = vset.pattern.permute.xlu1 %v1598_v4 }
  0x61   : > { %399 = vperm.xlu1 %1487, %v347_v19   ;;  %525 = vperm.xlu0 %1492, %v350_v20  }
  0x65   : > { %409 = vperm.xlu1 %1487, %v349_v21   ;;  %533 = vperm.xlu0 %1492, %v352_v22  }
  0x69   : > { %414 = vperm.xlu1 %1487, %v350_v20   ;;  %1494 = vset.pattern.permute.xlu0 %v1597_v3 }
  0x6a   : > { %630 = vperm.xlu0 %1494, %v351_v13  }
  0x6d   : > { %1488 = vset.pattern.permute.xlu1 %v1599_v8 }
  0x6e   : > { %517 = vperm.xlu1 %1488, %v1741_v9   ;;  %642 = vperm.xlu0 %1494, %v354_v14  }
  0x72   : > { %521 = vperm.xlu1 %1488, %v349_v21  }
  0x76   : > { %1489 = vset.pattern.permute.xlu1 %v1597_v3 }
  0x77   : > { %614 = vperm.xlu1 %1489, %v347_v19  }
  0x7b   : > { %622 = vperm.xlu1 %1489, %v349_v21  }
  0x7f   : > { %626 = vperm.xlu1 %1489, %v350_v20  }
  0x83   : > { %1491 = vset.pattern.permute.xlu1 %v1598_v4 }
  0x84   : > { %424 = vperm.xlu1 %1491, %v352_v22  }
  0x88   : > { %429 = vperm.xlu1 %1491, %v353_v23  }
  0x8c   : > { %1493 = vset.pattern.permute.xlu1 %v1599_v8 }
  0x8d   : > { %529 = vperm.xlu1 %1493, %v351_v13  }
  0x91   : > { %537 = vperm.xlu1 %1493, %v353_v23  }
  0x95   : > { %541 = vperm.xlu1 %1493, %v354_v14  }
  0x99   : > { %1495 = vset.pattern.permute.xlu1 %v1597_v3 }
  0x9a   : > { %634 = vperm.xlu1 %1495, %v352_v22  }
  0x9e   : > { %638 = vperm.xlu1 %1495, %v353_v23  }
  0xa2   : > { %v370_v24 = vpop.permute.xlu1 %369  ;;  %v587_v25 = vpop.permute.xlu0 %586 }
  0xa3   : > { %v443_v52 = vmul.f32 %v1790_v41, %v370_v24  ;;  %v650_v54 = vmul.f32 %v1814_v53, %v587_v25 }
  0xa5   : > { %v465_v62 = vadd.f32 %v1798_v45, %v443_v52 }
  0xa6   : > { %v375_v26 = vpop.permute.xlu1 %374  ;;  %v599_v27 = vpop.permute.xlu0 %598 }
  0xa7   : > { %v444_v60 = vmul.f32 %v1790_v41, %v375_v26  ;;  %v653_v10 = vmul.f32 %v1814_v53, %v599_v27 }
  0xa9   : > { %v466_v9 = vadd.f32 %v1798_v45, %v444_v60 }
  0xaa   : > { %v1781_v28 = vpop.permute.xlu0 %610 }
  0xab   : > { %v486_v29 = vpop.permute.xlu1 %485 }
  0xac   : > { %v549_v51 = vmul.f32 %v1803_v46, %v486_v29 }
  0xae   : > { %v1783_v30 = vpop.permute.xlu0 %618 }
  0xaf   : > { %v490_v31 = vpop.permute.xlu1 %489 }
  0xb0   : > { %v550_v58 = vmul.f32 %v1803_v46, %v490_v31 }
  0xb2   : > { %v566_v5 = vadd.f32 %v550_v58, %v465_v62 }
  0xb3   : > { %v360_v32 = vpop.permute.xlu0 %359 }
  0xb4   : > { %v583_v33 = vpop.permute.xlu1 %582  ;;  %v441_v49 = vmul.f32 %v1790_v41, %v360_v32 }
  0xb5   : > { %v649_v6 = vmul.f32 %v1814_v53, %v583_v33 }
  0xb6   : > { %v463_v59 = vadd.f32 %v1798_v45, %v441_v49 }
  0xb7   : > { %v365_v34 = vpop.permute.xlu0 %364 }
  0xb8   : > { %v591_v35 = vpop.permute.xlu1 %590  ;;  %v442_v43 = vmul.f32 %v1790_v41, %v365_v34 }
  0xb9   : > { %v651_v63 = vmul.f32 %v1814_v53, %v591_v35 }
  0xba   : > { %v464_v47 = vadd.f32 %v1798_v45, %v442_v43 }
  0xbb   : > { %v380_v36 = vpop.permute.xlu0 %379  ;;  %v667_v12 = vadd.f32 %v651_v63, %v566_v5 }
  0xbc   : > { %v595_v37 = vpop.permute.xlu1 %594  ;;  %v565_v55 = vadd.f32 %v549_v51, %v464_v47  ;;  %v445_v56 = vmul.f32 %v1790_v41, %v380_v36 }
  0xbd   : > { %v652_v16 = vmul.f32 %v1814_v53, %v595_v37  ;;  %v683_v33 = vmax.f32 %v667_v12, 0.0 }
  0xbe   : > { %v467_v1 = vadd.f32 %v1798_v45, %v445_v56  ;;  %v666_v4 = vadd.f32 %v650_v54, %v565_v55 }
  0xbf   : > { %v395_v38 = vpop.permute.xlu0 %394 }
  0xc0   : > { %v448_v7 = vmul.f32 %v1790_v41, %v395_v38  ;;  %v682_v19 = vmax.f32 %v666_v4, 0.0 }
  0xc1   : > { %v385_v39 = vpop.permute.xlu1 %384 }
  0xc2   : > { %v446_v13 = vmul.f32 %v1790_v41, %v385_v39  ;;  %v470_v20 = vadd.f32 %v1798_v45, %v448_v7 }
  0xc3   : > { %v1785_v40 = vpop.permute.xlu0 %404 }
  0xc4   : > { %v468_v27 = vadd.f32 %v1798_v45, %v446_v13  ;;  %v450_v63 = vmul.f32 %v1790_v41, %v1785_v40  ;;  %v658_v13 = vmul.f32 %v1814_v53, %v1783_v30 }
  0xc5   : > { %v390_v42 = vpop.permute.xlu1 %389 }
  0xc6   : > { %v447_v17 = vmul.f32 %v1790_v41, %v390_v42  ;;  %v472_v7 = vadd.f32 %v1798_v45, %v450_v63 }
  0xc7   : > { %v1793_v44 = vpop.permute.xlu0 %419 }
  0xc8   : > { %v469_v34 = vadd.f32 %v1798_v45, %v447_v17  ;;  %v453_v63 = vmul.f32 %v1790_v41, %v1793_v44 }
  0xca   : > { %v498_v48 = vpop.permute.xlu1 %497 }
  0xcb   : > { %v1807_v50 = vpop.permute.xlu0 %434  ;;  %v552_v2 = vmul.f32 %v1803_v46, %v498_v48  ;;  %v656_v48 = vmul.f32 %v1814_v53, %v1781_v28 }
  0xcd   : > { %v568_v18 = vadd.f32 %v552_v2, %v467_v1  ;;  %v884_v2 = vsel %vm744_vm1, %v682_v19, 0.0 }
  0xce   : > { %v506_v57 = vpop.permute.xlu1 %505 }
  0xcf   : > { %v554_v25 = vmul.f32 %v1803_v46, %v506_v57  ;;  %v669_v35 = vadd.f32 %v653_v10, %v568_v18 }
  0xd0   : > { %v482_v61 = vpop.permute.xlu0 %481 }
  0xd1   : > { %v548_v0 = vmul.f32 %v1803_v46, %v482_v61  ;;  %v570_v43 = vadd.f32 %v554_v25, %v469_v34  ;;  %v685_v54 = vmax.f32 %v669_v35, 0.0 }
  0xd2   : > { %v510_v3 = vpop.permute.xlu1 %509 }
  0xd3   : > { %v564_v8 = vadd.f32 %v548_v0, %v463_v59  ;;  %v555_v21 = vmul.f32 %v1803_v46, %v510_v3  ;;  %v890_v25 = vsel %vm744_vm1, %v685_v54, 0.0 }
  0xd4   : > { %v494_v11 = vpop.permute.xlu0 %493 }
  0xd5   : > { %v551_v14 = vmul.f32 %v1803_v46, %v494_v11  ;;  %v665_v15 = vadd.f32 %v649_v6, %v564_v8  ;;  %v571_v36 = vadd.f32 %v555_v21, %v470_v20 }
  0xd7   : > { %v567_v22 = vadd.f32 %v551_v14, %v466_v9  ;;  %v603_v23 = vpop.permute.xlu1 %602  ;;  %v681_v24 = vmax.f32 %v665_v15, 0.0  ;;  %v1845_v55 = vadd.f32 %v656_v48, %v571_v36  ;;  %v886_v9 = vsel %vm744_vm1, %v683_v33, 0.0 }
  0xd8   : > { %v502_v26 = vpop.permute.xlu0 %501  ;;  %v654_v38 = vmul.f32 %v1814_v53, %v603_v23 }
  0xd9   : > { %v668_v29 = vadd.f32 %v652_v16, %v567_v22  ;;  %v553_v31 = vmul.f32 %v1803_v46, %v502_v26  ;;  %v697_v32 = vpack.c.bf16 %v682_v19, %v681_v24  ;;  %v688_v60 = vmax.f32 %v1845_v55, 0.0 }
  0xda   : > { %v883_v0 = vsel %vm744_vm1, %v681_v24, 0.0 }
  0xdb   : > { %v684_v37 = vmax.f32 %v668_v29, 0.0  ;;  %v569_v39 = vadd.f32 %v553_v31, %v468_v27  ;;  %1288 = vmatprep.mubr.msk.bf16.mxu0 %vm744_vm1, %v697_v32  ;;  %v607_v42 = vpop.permute.xlu1 %606  ;;  %v885_v5 = vadd.f32 %v884_v2, %v883_v0  ;;  %v475_v2 = vadd.f32 %v1798_v45, %v453_v63 }
  0xdc   : > { %v655_v47 = vmul.f32 %v1814_v53, %v607_v42  ;;  %v514_v6 = vpop.permute.xlu0 %513 }
  0xdd   : > { %v698_v49 = vpack.c.bf16 %v684_v37, %v683_v33  ;;  %v670_v51 = vadd.f32 %v654_v38, %v569_v39  ;;  %v556_v40 = vmul.f32 %v1803_v46, %v514_v6  ;;  %v887_v12 = vadd.f32 %v886_v9, %v885_v5 }
  0xde   : > { %v671_v52 = vadd.f32 %v655_v47, %v570_v43  ;;  %v888_v14 = vsel %vm744_vm1, %v684_v37, 0.0 }
  0xdf   : > { %v686_v56 = vmax.f32 %v670_v51, 0.0  ;;  %1289 = vmatmul.mubr.msk.bf16.vlgmr.msra.gmra.mrb[0].mxu0 %vm744_vm1, %v698_v49  ;;  %v889_v22 = vadd.f32 %v888_v14, %v887_v12  ;;  %v456_v12 = vmul.f32 %v1790_v41, %v1807_v50 }
  0xe0   : > { %v400_v57 = vpop.permute.xlu1 %399  ;;  %v687_v59 = vmax.f32 %v671_v52, 0.0  ;;  %v526_v19 = vpop.permute.xlu0 %525 }
  0xe1   : > { %v699_v58 = vpack.c.bf16 %v686_v56, %v685_v54  ;;  %v449_v3 = vmul.f32 %v1790_v41, %v400_v57  ;;  %v559_v26 = vmul.f32 %v1803_v46, %v526_v19  ;;  %v891_v34 = vadd.f32 %v890_v25, %v889_v22 }
  0xe2   : > { %v700_v62 = vpack.c.bf16 %v688_v60, %v687_v59  ;;  %v892_v35 = vsel %vm744_vm1, %v686_v56, 0.0  ;;  %v894_v48 = vsel %vm744_vm1, %v687_v59, 0.0  ;;  %v896_v56 = vsel %vm744_vm1, %v688_v60, 0.0 }
  0xe3   : > { %1292 = vmatprep.mubr.msk.bf16.mxu0 %vm744_vm1, %v699_v58  ;;  %v471_v10 = vadd.f32 %v1798_v45, %v449_v3  ;;  %v893_v47 = vadd.f32 %v892_v35, %v891_v34 }
  0xe4   : > { %v410_v61 = vpop.permute.xlu1 %409  ;;  %v534_v58 = vpop.permute.xlu0 %533 }
  0xe5   : > { %v451_v15 = vmul.f32 %v1790_v41, %v410_v61  ;;  %v572_v17 = vadd.f32 %v556_v40, %v471_v10  ;;  %v895_v55 = vadd.f32 %v894_v48, %v893_v47 }
  0xe7   : > { %1293 = vmatmul.mubr.msk.bf16.gmra.mrb[4].mxu0 %vm744_vm1, %v700_v62  ;;  %v473_v30 = vadd.f32 %v1798_v45, %v451_v15 }
  0xe8   : > { %v415_v28 = vpop.permute.xlu1 %414 }
  0xe9   : > { %v452_v18 = vmul.f32 %v1790_v41, %v415_v28  ;;  %v897_v28 = vadd.f32 %v896_v56, %v895_v55  ;;  %v631_v59 = vpop.permute.xlu0 %630  ;;  %v882_v55 = vld [vmem:[#allocation2] sm:$0x1] }
  0xea   : > { %v661_v60 = vmul.f32 %v1814_v53, %v631_v59  ;;  %v1224_v56 = vld [vmem:[%s2058_s4] ss:$0 sm:$0xff] }
  0xeb   : > { %v474_v29 = vadd.f32 %v1798_v45, %v452_v18 }
  0xed   : > { %v518_v1 = vpop.permute.xlu1 %517  ;;  %v575_v39 = vadd.f32 %v559_v26, %v474_v29  ;;  %v643_v19 = vpop.permute.xlu0 %642 }
  0xee   : > { %v557_v4 = vmul.f32 %v1803_v46, %v518_v1 }
  0xf0   : > { %v573_v11 = vadd.f32 %v557_v4, %v472_v7 }
  0xf1   : > { %v522_v8 = vpop.permute.xlu1 %521 }
  0xf2   : > { %v674_v21 = vadd.f32 %v658_v13, %v573_v11  ;;  %v558_v23 = vmul.f32 %v1803_v46, %v522_v8 }
  0xf4   : > { %v690_v33 = vmax.f32 %v674_v21, 0.0  ;;  %v574_v36 = vadd.f32 %v558_v23, %v473_v30  ;;  %v561_v21 = vmul.f32 %v1803_v46, %v534_v58  ;;  %v664_v23 = vmul.f32 %v1814_v53, %v643_v19 }
  0xf6   : > { %v615_v16 = vpop.permute.xlu1 %614  ;;  %v900_v3 = vsel %vm744_vm1, %v690_v33, 0.0 }
  0xf7   : > { %v657_v20 = vmul.f32 %v1814_v53, %v615_v16 }
  0xf9   : > { %v673_v24 = vadd.f32 %v657_v20, %v572_v17  ;;  %v478_v20 = vadd.f32 %v1798_v45, %v456_v12 }
  0xfa   : > { %v623_v27 = vpop.permute.xlu1 %622 }
  0xfb   : > { %v689_v31 = vmax.f32 %v673_v24, 0.0  ;;  %v659_v32 = vmul.f32 %v1814_v53, %v623_v27 }
  0xfd   : > { %v701_v37 = vpack.c.bf16 %v690_v33, %v689_v31  ;;  %v675_v42 = vadd.f32 %v659_v32, %v574_v36  ;;  %v898_v61 = vsel %vm744_vm1, %v689_v31, 0.0 }
  0xfe   : > { %v627_v38 = vpop.permute.xlu1 %626  ;;  %v899_v0 = vadd.f32 %v898_v61, %v897_v28 }
  0xff   : > { %v660_v43 = vmul.f32 %v1814_v53, %v627_v38  ;;  %1296 = vmatprep.mubr.msk.bf16.mxu1 %vm744_vm1, %v701_v37  ;;  %v691_v51 = vmax.f32 %v675_v42, 0.0 }
 0x100   : > { %v901_v5 = vadd.f32 %v900_v3, %v899_v0 }
 0x101   : > { %v676_v49 = vadd.f32 %v660_v43, %v575_v39  ;;  %v902_v6 = vsel %vm744_vm1, %v691_v51, 0.0 }
 0x102   : > { %v903_v44 = vadd.f32 %v902_v6, %v901_v5 }
 0x103   : > { %v692_v52 = vmax.f32 %v676_v49, 0.0  ;;  %v425_v54 = vpop.permute.xlu1 %424 }
 0x104   : > { %v454_v40 = vmul.f32 %v1790_v41, %v425_v54 }
 0x105   : > { %v702_v57 = vpack.c.bf16 %v692_v52, %v691_v51  ;;  %v904_v9 = vsel %vm744_vm1, %v692_v52, 0.0 }
 0x106   : > { %v905_v13 = vadd.f32 %v904_v9, %v903_v44  ;;  %v476_v16 = vadd.f32 %v1798_v45, %v454_v40 }
 0x107   : > { %1297 = vmatmul.mubr.msk.bf16.vlgmr.msra.gmra.mrb[0].mxu1 %vm744_vm1, %v702_v57  ;;  %v430_v62 = vpop.permute.xlu1 %429 }
 0x108   : > { %v455_v22 = vmul.f32 %v1790_v41, %v430_v62  ;;  %v577_v30 = vadd.f32 %v561_v21, %v476_v16 }
 0x10a   : > { %v477_v27 = vadd.f32 %v1798_v45, %v455_v22 }
 0x10c   : > { %v530_v1 = vpop.permute.xlu1 %529 }
 0x10d   : > { %v560_v4 = vmul.f32 %v1803_v46, %v530_v1 }
 0x10f   : > { %v576_v7 = vadd.f32 %v560_v4, %v475_v2 }
 0x110   : > { %v538_v8 = vpop.permute.xlu1 %537 }
 0x111   : > { %v677_v10 = vadd.f32 %v661_v60, %v576_v7  ;;  %v562_v50 = vmul.f32 %v1803_v46, %v538_v8 }
 0x113   : > { %v693_v11 = vmax.f32 %v677_v10, 0.0  ;;  %v578_v32 = vadd.f32 %v562_v50, %v477_v27 }
 0x114   : > { %v542_v14 = vpop.permute.xlu1 %541 }
 0x115   : > { %v906_v15 = vsel %vm744_vm1, %v693_v11, 0.0  ;;  %v563_v18 = vmul.f32 %v1803_v46, %v542_v14 }
 0x116   : > { %v907_v17 = vadd.f32 %v906_v15, %v905_v13 }
 0x117   : > { %v579_v25 = vadd.f32 %v563_v18, %v478_v20 }
 0x119   : > { %v635_v24 = vpop.permute.xlu1 %634  ;;  %v680_v33 = vadd.f32 %v664_v23, %v579_v25 }
 0x11a   : > { %v662_v26 = vmul.f32 %v1814_v53, %v635_v24 }
 0x11b   : > { %v696_v38 = vmax.f32 %v680_v33, 0.0 }
 0x11c   : > { %v678_v29 = vadd.f32 %v662_v26, %v577_v30 }
 0x11d   : > { %v639_v31 = vpop.permute.xlu1 %638  ;;  %v912_v47 = vsel %vm744_vm1, %v696_v38, 0.0 }
 0x11e   : > { %v694_v34 = vmax.f32 %v678_v29, 0.0  ;;  %v663_v35 = vmul.f32 %v1814_v53, %v639_v31 }
 0x120   : > { %v703_v36 = vpack.c.bf16 %v694_v34, %v693_v11  ;;  %v908_v41 = vsel %vm744_vm1, %v694_v34, 0.0  ;;  %v679_v37 = vadd.f32 %v663_v35, %v578_v32 }
 0x121   : > { %v909_v46 = vadd.f32 %v908_v41, %v907_v17 }
 0x122   : > { %v695_v39 = vmax.f32 %v679_v37, 0.0  ;;  %1300 = vmatprep.mubr.msk.bf16.mxu1 %vm744_vm1, %v703_v36 }
 0x124   : > { %v704_v42 = vpack.c.bf16 %v696_v38, %v695_v39  ;;  %v910_v43 = vsel %vm744_vm1, %v695_v39, 0.0 }
 0x125   : > { %v911_v45 = vadd.f32 %v910_v43, %v909_v46 }
 0x126   : > { %1301 = vmatmul.mubr.msk.bf16.gmra.mrb[4].mxu1 %vm744_vm1, %v704_v42 }
 0x127   : > { %v913_v48 = vadd.f32 %v912_v47, %v911_v45 }
 0x129   : > { %v914_v49 = vrot.slane %v913_v48, 4 }
 0x12b   : > { %v915_v53 = vadd.f32 %v914_v49, %v913_v48 }
 0x12d   : > { %v916_v51 = vrot.slane %v915_v53, 2 }
 0x12f   : > { %v917_v52 = vadd.f32 %v916_v51, %v915_v53 }
 0x131   : > { %v918_v54 = vrot.slane %v917_v52, 1 }
 0x133   : > { %v919_v57 = vadd.f32 %v918_v54, %v917_v52 }
 0x135   : > { %v920_v58 = vadd.f32 %v919_v57, %v882_v55 }
 0x137   : > { %922 = vst.msk [vmem:[#allocation2] sm:$0x1] %vm921_vm2, %v920_v58 }
 0x1b2   : > { %v1290_v61 = vpop.f32.mrb[0].mxu0 }
 0x1b3   : > { %v803_v62 = vpop.f32.mrb[1].mxu0  ;;  %v812_v59 = vadd.f32 %v1290_v61, %v1224_v56 }
 0x1b4   : > { %v804_v28 = vadd.f32 %v1224_v56, %v803_v62  ;;  %v1291_v63 = vpop.f32.mrb[2].mxu0 }
 0x1b5   : > { %v806_v0 = vpop.f32.mrb[3].mxu0  ;;  %v815_v3 = vadd.f32 %v1291_v63, %v1224_v56  ;;  %v868_v60 = vmax.f32 %v812_v59, 0.0  ;;  %v923_v59 = vld [vmem:[#allocation3] sm:$0x1] }
 0x1b6   : > { %v807_v1 = vadd.f32 %v1224_v56, %v806_v0  ;;  %v866_v2 = vmax.f32 %v804_v28, 0.0 }
 0x1b7   : > { %v869_v8 = vmax.f32 %v815_v3, 0.0  ;;  %v964_v3 = vld [vmem:[%s2060_s6 + $0x8] sm:$0xff] (!%p1237_p1) }
 0x1b8   : > { %v867_v4 = vmax.f32 %v807_v1, 0.0 }
 0x1ba   : > { %v924_v5 = vadd.f32 %v867_v4, %v866_v2  ;;  %v1294_v6 = vpop.f32.mrb[4].mxu0  ;;  %v965_v4 = vld [vmem:[%s2060_s6 + $0x10] sm:$0xff] (!%p1237_p1) }
 0x1bb   : > { %v819_v7 = vpop.f32.mrb[5].mxu0  ;;  %v828_v11 = vadd.f32 %v1294_v6, %v1224_v56  ;;  %v966_v6 = vld [vmem:[%s2060_s6 + $0x18] sm:$0xff] (!%p1237_p1) }
 0x1bc   : > { %v925_v9 = vadd.f32 %v924_v5, %v868_v60  ;;  %v820_v10 = vadd.f32 %v1224_v56, %v819_v7  ;;  %v1295_v44 = vpop.f32.mrb[6].mxu0  ;;  %v1600_v60 = vmov (!%p1237_p1), 0.0|0.0   ;;  %v955_v7 = vld [vmem:[%s2059_s5] sm:$0xff] (!%p1237_p1) }
 0x1bd   : > { %v822_v40 = vpop.f32.mrb[7].mxu0  ;;  %v831_v16 = vadd.f32 %v1295_v44, %v1224_v56  ;;  %v872_v18 = vmax.f32 %v828_v11, 0.0  ;;  %1358 = vmatprep.subr.bf16.mxu0 (!%p1237_p1), %v1600_v60  ;;  %1382 = vmatprep.subr.bf16.mxu1 (!%p1237_p1), %v1600_v60  ;;  %v956_v44 = vld [vmem:[%s2059_s5 + $0x8] sm:$0xff] (!%p1237_p1) }
 0x1be   : > { %v870_v12 = vmax.f32 %v820_v10, 0.0  ;;  %v926_v13 = vadd.f32 %v925_v9, %v869_v8  ;;  %v823_v14 = vadd.f32 %v1224_v56, %v822_v40  ;;  %v1602_v8 = vmov (!%p1237_p1), 0.0   ;;  %v967_v10 = vld [vmem:[%s2060_s6 + $0x20] sm:$0xff] (!%p1237_p1)  ;;  %v968_v40 = vld [vmem:[%s2060_s6 + $0x28] sm:$0xff] (!%p1237_p1) }
 0x1bf   : > { %v873_v20 = vmax.f32 %v831_v16, 0.0  ;;  %1355 = vmatprep.mubr.msk.f32.mxu1 (!%p1237_p1), %vm1601_vm3, %v1602_v8  ;;  %1336 = vmatprep.mubr.msk.f32.mxu0 (!%p1237_p1), %vm1601_vm3, %v1602_v8  ;;  %v1362_v9 = vpack.c.bf16 (!%p1237_p1), %v966_v6, %v965_v4  ;;  %v1383_v11 = vpack.c.bf16 (!%p1237_p1), %v956_v44, %v955_v7  ;;  %v959_v16 = vld [vmem:[%s2059_s5 + $0x20] sm:$0xff] (!%p1237_p1) }
 0x1c0   : > { %v927_v15 = vadd.f32 %v926_v13, %v870_v12  ;;  %v871_v17 = vmax.f32 %v823_v14, 0.0  ;;  %v957_v12 = vld [vmem:[%s2059_s5 + $0x10] sm:$0xff] (!%p1237_p1)  ;;  %v958_v13 = vld [vmem:[%s2059_s5 + $0x18] sm:$0xff] (!%p1237_p1) }
 0x1c1   : > { %1384 = vmatpush3.bf16.msra.mxu1 (!%p1237_p1), %v1383_v11  ;;  %v1386_v14 = vpack.c.bf16 (!%p1237_p1), %v958_v13, %v957_v12 }
 0x1c2   : > { %v928_v19 = vadd.f32 %v927_v15, %v871_v17  ;;  %v1365_v15 = vpack.c.bf16 (!%p1237_p1), %v968_v40, %v967_v10  ;;  %1385 = vmatprep.subr.bf16.mxu1 (!%p1237_p1), %v1600_v60  ;;  %v960_v17 = vld [vmem:[%s2059_s5 + $0x28] sm:$0xff] (!%p1237_p1) }
 0x1c4   : > { %v929_v21 = vadd.f32 %v928_v19, %v872_v18  ;;  %v969_v18 = vld [vmem:[%s2060_s6 + $0x30] sm:$0xff] (!%p1237_p1)  ;;  %v970_v19 = vld [vmem:[%s2060_s6 + $0x38] sm:$0xff] (!%p1237_p1) }
 0x1c5   : > { %1387 = vmatpush3.bf16.msra.mxu1 (!%p1237_p1), %v1386_v14 }
 0x1c6   : > { %v930_v22 = vadd.f32 %v929_v21, %v873_v20  ;;  %v1389_v20 = vpack.c.bf16 (!%p1237_p1), %v960_v17, %v959_v16  ;;  %v1368_v21 = vpack.c.bf16 (!%p1237_p1), %v970_v19, %v969_v18  ;;  %1388 = vmatprep.subr.bf16.mxu1 (!%p1237_p1), %v1600_v60 }
 0x1c9   : > { %1390 = vmatpush3.bf16.msra.mxu1 (!%p1237_p1), %v1389_v20 }
 0x1ca   : > { %1391 = vmatprep.subr.bf16.mxu1 (!%p1237_p1), %v1600_v60 }
 0x1da   : > { %v1298_v23 = vpop.f32.mrb[0].mxu1 }
 0x1db   : > { %v835_v24 = vpop.f32.mrb[1].mxu1  ;;  %v844_v26 = vadd.f32 %v1298_v23, %v1224_v56  ;;  %v962_v23 = vld [vmem:[%s2059_s5 + $0x38] sm:$0xff] (!%p1237_p1) }
 0x1dc   : > { %v836_v50 = vadd.f32 %v1224_v56, %v835_v24  ;;  %v1299_v25 = vpop.f32.mrb[2].mxu1  ;;  %v971_v24 = vld [vmem:[%s2060_s6 + $0x40] sm:$0xff] (!%p1237_p1) }
 0x1dd   : > { %v838_v30 = vpop.f32.mrb[3].mxu1  ;;  %v847_v32 = vadd.f32 %v1299_v25, %v1224_v56  ;;  %v876_v34 = vmax.f32 %v844_v26, 0.0 }
 0x1de   : > { %v874_v27 = vmax.f32 %v836_v50, 0.0  ;;  %v839_v29 = vadd.f32 %v1224_v56, %v838_v30  ;;  %v972_v50 = vld [vmem:[%s2060_s6 + $0x48] sm:$0xff] (!%p1237_p1)  ;;  %v951_v30 = vld [vmem:[#allocation2] sm:$0x1] (!%p1237_p1) }
 0x1df   : > { %v877_v36 = vmax.f32 %v847_v32, 0.0  ;;  %v1371_v26 = vpack.c.bf16 (!%p1237_p1), %v972_v50, %v971_v24 }
 0x1e0   : > { %v931_v31 = vadd.f32 %v930_v22, %v874_v27  ;;  %v875_v33 = vmax.f32 %v839_v29, 0.0  ;;  %v961_v22 = vld [vmem:[%s2059_s5 + $0x30] sm:$0xff] (!%p1237_p1)  ;;  %v974_v29 = vld [vmem:[%s2060_s6 + $0x58] sm:$0xff] (!%p1237_p1) }
 0x1e1   : > { %v1392_v25 = vpack.c.bf16 (!%p1237_p1), %v962_v23, %v961_v22  ;;  %v973_v27 = vld [vmem:[%s2060_s6 + $0x50] sm:$0xff] (!%p1237_p1) }
 0x1e2   : > { %v932_v35 = vadd.f32 %v931_v31, %v875_v33  ;;  %v952_v31 = vmul.f32 (!%p1237_p1), 0.00390625, %v951_v30  ;;  %v1374_v32 = vpack.c.bf16 (!%p1237_p1), %v974_v29, %v973_v27  ;;  %v975_v33 = vld [vmem:[%s2060_s6 + $0x60] sm:$0xff] (!%p1237_p1) }
 0x1e3   : > { %1393 = vmatpush3.bf16.msra.mxu1 (!%p1237_p1), %v1392_v25 }
 0x1e4   : > { %v933_v41 = vadd.f32 %v932_v35, %v876_v34  ;;  %v976_v34 = vld [vmem:[%s2060_s6 + $0x68] sm:$0xff] (!%p1237_p1) }
 0x1e5   : > { %v1377_v35 = vpack.c.bf16 (!%p1237_p1), %v976_v34, %v975_v33 }
 0x1e6   : > { %v934_v37 = vadd.f32 %v933_v41, %v877_v36  ;;  %1356 = vmatmul.mubr.msk.f32.vlgmr.msra.gmra.mrb[0].mxu1 (!%p1237_p1), %vm744_vm1, %v952_v31  ;;  %v977_v36 = vld [vmem:[%s2060_s6 + $0x70] sm:$0xff] (!%p1237_p1)  ;;  %v978_v41 = vld [vmem:[%s2060_s6 + $0x78] sm:$0xff] (!%p1237_p1) }
 0x1f9   : > { %v1302_v38 = vpop.f32.mrb[4].mxu1 }
 0x1fa   : > { %v851_v39 = vpop.f32.mrb[5].mxu1  ;;  %v860_v45 = vadd.f32 %v1302_v38, %v1224_v56 }
 0x1fb   : > { %v852_v46 = vadd.f32 %v1224_v56, %v851_v39  ;;  %v1303_v42 = vpop.f32.mrb[6].mxu1 }
 0x1fc   : > { %v854_v43 = vpop.f32.mrb[7].mxu1  ;;  %v863_v53 = vadd.f32 %v1303_v42, %v1224_v56  ;;  %v880_v52 = vmax.f32 %v860_v45, 0.0  ;;  %v1122_v45 = vld [vmem:[%s2061_s7] sm:$0x1] (!%p1237_p1) }
 0x1fd   : > { %v878_v47 = vmax.f32 %v852_v46, 0.0  ;;  %v855_v48 = vadd.f32 %v1224_v56, %v854_v43  ;;  %v963_v56 = vld [vmem:[%s2060_s6] sm:$0xff] (!%p1237_p1) }
 0x1fe   : > { %v881_v55 = vmax.f32 %v863_v53, 0.0  ;;  %v1359_v5 = vpack.c.bf16 (!%p1237_p1), %v964_v3, %v963_v56 }
 0x1ff   : > { %v935_v49 = vadd.f32 %v934_v37, %v878_v47  ;;  %v879_v51 = vmax.f32 %v855_v48, 0.0  ;;  %v1380_v37 = vpack.c.bf16 (!%p1237_p1), %v978_v41, %v977_v36 }
 0x200   : > { %1360 = vmatpush3.bf16.msra.mxu0 (!%p1237_p1), %v1359_v5 }
 0x201   : > { %v936_v54 = vadd.f32 %v935_v49, %v879_v51  ;;  %1361 = vmatprep.subr.bf16.mxu0 (!%p1237_p1), %v1600_v60 }
 0x203   : > { %v937_v57 = vadd.f32 %v936_v54, %v880_v52 }
 0x204   : > { %1363 = vmatpush3.bf16.msra.mxu0 (!%p1237_p1), %v1362_v9 }
 0x205   : > { %v938_v58 = vadd.f32 %v937_v57, %v881_v55  ;;  %1364 = vmatprep.subr.bf16.mxu0 (!%p1237_p1), %v1600_v60 }
 0x207   : > { %v939_v61 = vrot.slane %v938_v58, 4 }
 0x208   : > { %1366 = vmatpush3.bf16.msra.mxu0 (!%p1237_p1), %v1365_v15 }
 0x209   : > { %v940_v62 = vadd.f32 %v939_v61, %v938_v58  ;;  %1367 = vmatprep.subr.bf16.mxu0 (!%p1237_p1), %v1600_v60 }
 0x20b   : > { %v941_v28 = vrot.slane %v940_v62, 2 }
 0x20c   : > { %1369 = vmatpush3.bf16.msra.mxu0 (!%p1237_p1), %v1368_v21 }
 0x20d   : > { %v942_v63 = vadd.f32 %v941_v28, %v940_v62  ;;  %1370 = vmatprep.subr.bf16.mxu0 (!%p1237_p1), %v1600_v60 }
 0x20f   : > { %v943_v0 = vrot.slane %v942_v63, 1  ;;  %950 = sbr.rel (%p1237_p1) target bundleno = 760 (0x2f8), region = 60 }
 0x210   : > { %1372 = vmatpush3.bf16.msra.mxu0 (!%p1237_p1), %v1371_v26 }
 0x211   : > { %v944_v1 = vadd.f32 %v943_v0, %v942_v63  ;;  %1373 = vmatprep.subr.bf16.mxu0 (!%p1237_p1), %v1600_v60 }
 0x213   : > { %v945_v2 = vadd.f32 %v944_v1, %v923_v59 }
 0x214   : > { %1375 = vmatpush3.bf16.msra.mxu0 (!%p1237_p1), %v1374_v32 }
 0x215   : > { %946 = vst [vmem:[#allocation3] sm:$0x1] %v945_v2  ;;  %1376 = vmatprep.subr.bf16.mxu0 (!%p1237_p1), %v1600_v60 }
 0x218   : > { %1378 = vmatpush3.bf16.msra.mxu0 %v1377_v35 }
 0x219   : > { %1379 = vmatprep.subr.bf16.mxu0 %v1600_v60 }
 0x21c   : > { %v953_v38 = vld [vmem:[#allocation3] sm:$0x1]  ;;  %1381 = vmatpush3.bf16.msra.mxu0 %v1380_v37 }
 0x21d   : > { %v954_v39 = vmul.f32 0.00390625, %v953_v38 }
 0x21f   : > { %1337 = vmatmul.mubr.f32.vlgmr.msra.gmra.mrb[0].mxu0 %v954_v39 }
 0x2b9   : > { %v1118_v46 = vpop.f32.mrb[0].mxu1 }
 0x2ba   : > { %v1357_v42 = vpop.f32.mrb[1].mxu1 }
 0x2f2   : > { %v1045_v43 = vpop.f32.mrb[0].mxu0 }
 0x2f3   : > { %v1119_v47 = vadd.f32 %v1118_v46, %v1045_v43  ;;  %v1338_v48 = vpop.f32.mrb[1].mxu0 }
 0x2f5   : > { %v1123_v49 = vadd.f32 %v1122_v45, %v1119_v47 }
 0x2f7   : > { %1125 = vst.msk [vmem:[%s1729_s20] sm:$0x1] %vm1124_vm4, %v1123_v49 }
 0x2f8 PF: > { %s1239_s25 = sshll.u32 %s1582_s9, 4  ;;  %s1139_s16 = sshll.u32 %s1729_s20, 4  ;;  %s1140_s16 = int_to_ptr.vmem [resolvable:$true] %s1139_s16 }
 0x2f9   : > { %s2004_s14 = scalar_lea.hbm %s2062_s8, %s1239_s25  ;;  %s2070_s19 = sand.u32 1, %s1570_s28  }
 0x2fa   : > { %s1127_s22 = scalar_lea.sflag [#allocation5], %s2070_s19  ;;  %s1500_s23 = scalar_lea.vmem %s1140_s16, 16 }
 0x2fb   : > { %p1501_p2 = scmp.ne.s32.totalorder %s1140_s16, %s1500_s23  ;;  %s1603_s30 = smov [#allocation4]  }
 0x2fc   : > { %s1504_s24 = sshll.u32 %s1603_s30, 4  ;;  %s1505_s24 = int_to_ptr.vmem [resolvable:$false] %s1504_s24 }
 0x2fd   : > { %p1502_p4 = pnand %p1501_p2, %p1698_p3  ;;  %s1506_s0 = scalar_lea.vmem %s1505_s24, 32 }
 0x2fe   : > { %p1507_p6 = scmp.lt.s32.totalorder %s1140_s16, %s1505_s24  ;;  %p1508_p7 = scmp.lt.s32.totalorder %s1506_s0, %s1500_s23 }
 0x2ff   : > { %p1503_p5 = pneg %p1502_p4 }
 0x300   : > { %p1509_p8 = por %p1508_p7, %p1507_p6 }
 0x302   : > { %p1510_p10 = pnand %p1509_p8, %p1503_p5 }
 0x304   : > { %1513 = shalt.err (!%p1510_p10)
}
 0x305   : > { %s1514_s9 = scalar_lea.hbm %s2004_s14, 16  ;;  %s1518_s26 = scalar_lea.hbm %s2062_s8, 32 }
 0x306   : > { %p1515_p11 = scmp.ne.s32.totalorder %s2004_s14, %s1514_s9  ;;  %p1519_p0 = scmp.lt.u32.totalorder %s2004_s14, %s2062_s8 }
 0x307   : > { %p1520_p1 = scmp.lt.u32.totalorder %s1518_s26, %s1514_s9  ;;  %p1522_p4 = scmp.lt.u32.totalorder %s1514_s9, %s2004_s14 }
 0x308   : > { %p1516_p12 = pnand %p1515_p11, %p1698_p3 }
 0x309   : > { %p1521_p2 = por %p1520_p1, %p1519_p0 }
 0x30a   : > { %p1517_p13 = pneg %p1516_p12 }
 0x30b   : > { %p1523_p5 = por %p1522_p4, %p1521_p2 }
 0x30d   : > { %p1524_p6 = pnand %p1523_p5, %p1517_p13 }
 0x30f   : > { %1527 = shalt.err (!%p1524_p6)
}
 0x310   : > { %1402 = dma.vmem_to_hbm [thread:$0]  (%p1698_p3), %s1140_s16, 16, %s2004_s14, %s1127_s22  }
 0x311 PF: > { %p1408_p7 = scmp.ge.s32.totalorder %s1594_s12, 2  ;;  %s1151_s0 = sand.u32 1, %s1566_s27  }
 0x312   : > { %s1152_s23 = scalar_lea.sflag [#allocation5], %s1151_s0 }
 0x313   : > { %p1405_p8 = pnand %p1408_p7, %p1708_p9 }
 0x315   : > { %1561 = dma.done.wait (!%p1405_p8), %s1152_s23, 16  }
 0x316   : > { %1563 = vsyncadd (!%p1405_p8), %s1152_s23, 4294967280  ;;  %s21_s12 = sadd.s32 1, %s1594_s12   ;;  %s2071_s17 = sld [smem:[#allocation7_spill]] }
 0x317   : > { %p18_p10 = scmp.ge.s32.totalorder %s21_s12, 6   ;;  %s2072_s27 = smov %s1570_s28 }
 0x318   : > { %s2073_s28 = smov %s1574_s29  ;;  %s2074_s29 = smov %s1716_s21 }
 0x319   : > { %s2075_s30 = smov %s1586_s10  ;;  %s2076_s9 = smov %s1590_s11 }
 0x31a   : > { %s2077_s10 = smov %s2080_s15  ;;  %20 = sbr.rel (!%p18_p10) target bundleno = 7 (0x7), region = 95 }
 0x31c   : > { %s2078_s11 = smov %s2071_s17 }
 0x321   :  { %1156 = vsyncpa [#allocation5], 1 }
 0x322   :  { %1158 = vsyncpa [#allocation5 + $0x1], 1 }

</bundles_post_ra>
